<compile_context>
chip_gen: v7x
topology: tpu7x:2x2x1
jax: 0.10.0
libtpu: 0.0.40
codegen_flags: <defaults>
</compile_context>

<pallas_src>
import jax
import jax.numpy as jnp
from jax.experimental import pallas as pl
from jax.experimental.pallas import tpu as pltpu


# ---------------------------------------------------------------------------
# helpers
# ---------------------------------------------------------------------------
def _round_up(x, m):
    return ((x + m - 1) // m) * m


def _pad_to(x, axis, target):
    pad = target - x.shape[axis]
    if pad == 0:
        return x
    widths = [(0, 0)] * x.ndim
    widths[axis] = (0, pad)
    return jnp.pad(x, widths)


def _pick_tile_n(n, k, d):
    # Crude per-query-row VMEM estimate (f32, pipeline double-buffers each block):
    #   kk + vv + attn (k*d lanes each), relpos (one 128-lane tile per neighbor),
    #   q / pre / res / misc (~4*d).  Stay well inside the default scoped VMEM so
    #   the same tiling works on v5e/v6e (128 MiB) and v7x (64 MiB).
    bytes_per_row = 4 * (3 * k * d + 128 * k + 4 * d)
    budget = 10 * 1024 * 1024
    tile = max(8, min(512, budget // max(bytes_per_row, 1)))
    tile = max(8, (tile // 8) * 8)
    n8 = _round_up(n, 8)                    # keep the sublane dim 8-aligned
    if n8 <= tile:
        return n8, n8
    return tile, _round_up(n, tile)


def square_distance(src, dst):
    return (jnp.sum(src ** 2, -1)[:, :, None]
            + jnp.sum(dst ** 2, -1)[:, None, :]
            - 2.0 * jnp.einsum('bnc,bmc->bnm', src, dst))


def _index_points(points, idx):
    # points: (B, N, C); idx: (B, ...) -> (B, ..., C)
    return jax.vmap(lambda p, i: p[i])(points, idx)


def _knn_indices(xyz, k):
    # TODO(synk): the PyTorch module uses a full argsort; lax.top_k selects the same
    # k nearest neighbours (ascending distance) without the O(N^2 log N) sort.
    dists = square_distance(xyz, xyz)
    _, idx = jax.lax.top_k(-dists, k)       # (B, N, K)
    return idx


# ---------------------------------------------------------------------------
# Kernel 1: fused projection  qkv = features @ (w1 @ [wq|wk|wv]) + b1 @ [wq|wk|wv]
# ---------------------------------------------------------------------------
def _proj_kernel(feat_ref, w_ref, b_ref, qkv_ref):
    qkv_ref[0] = (jnp.dot(feat_ref[0], w_ref[...],
                          preferred_element_type=jnp.float32) + b_ref[...])


def _projections(features, w_fold, b_fold, tile_n):
    B, Np, P = features.shape
    D3 = w_fold.shape[1]
    grid = (B, Np // tile_n)
    return pl.pallas_call(
        _proj_kernel,
        out_shape=jax.ShapeDtypeStruct((B, Np, D3), jnp.float32),
        grid=grid,
        in_specs=[
            pl.BlockSpec((1, tile_n, P), lambda b, nt: (b, nt, 0)),
            pl.BlockSpec((P, D3), lambda b, nt: (0, 0)),
            pl.BlockSpec((1, D3), lambda b, nt: (0, 0)),
        ],
        out_specs=pl.BlockSpec((1, tile_n, D3), lambda b, nt: (b, nt, 0)),
        compiler_params=pltpu.CompilerParams(
            dimension_semantics=("parallel", "parallel")),
    )(features, w_fold, b_fold)


# ---------------------------------------------------------------------------
# Kernel 2: pos-enc MLP, gamma MLP, softmax over neighbors, weighted sum,
#           fc2 + residual -- all K neighbors stacked into the matmul M dim.
# ---------------------------------------------------------------------------
def _attn_kernel(relpos_ref, q_ref, kk_ref, vv_ref, pre_ref,
                 wd1_ref, bd1_ref, wd2_ref, bd2_ref,
                 wg1_ref, bg1_ref, wg2_ref, bg2_ref,
                 w2_ref, b2_ref,
                 res_ref, attn_ref):
    K, TN, D = kk_ref.shape[1], kk_ref.shape[2], kk_ref.shape[3]

    # positional encoding MLP, stacked over all K*TN rows (one MXU pass per layer)
    rel = relpos_ref[0].reshape(K * TN, 3)
    h = jnp.maximum(
        jnp.dot(rel, wd1_ref[...], preferred_element_type=jnp.float32)
        + bd1_ref[...], 0.0)
    pos = (jnp.dot(h, wd2_ref[...], preferred_element_type=jnp.float32)
           + bd2_ref[...])                                   # (K*TN, D)
    pos3 = pos.reshape(K, TN, D)

    # gamma MLP input: q - k + pos  (q broadcast over the neighbor axis)
    q = q_ref[0]                                             # (TN, D)
    gin = (q[None, :, :] - kk_ref[0] + pos3).reshape(K * TN, D)
    hg = jnp.maximum(
        jnp.dot(gin, wg1_ref[...], preferred_element_type=jnp.float32)
        + bg1_ref[...], 0.0)
    # 1/sqrt(D) softmax scale is pre-folded into wg2 / bg2 by the wrapper.
    gamma = (jnp.dot(hg, wg2_ref[...], preferred_element_type=jnp.float32)
             + bg2_ref[...]).reshape(K, TN, D)

    # softmax over the neighbor axis (axis 0 here == dim=-2 in the PyTorch code)
    m = jnp.max(gamma, axis=0, keepdims=True)
    e = jnp.exp(gamma - m)
    a = e * pl.reciprocal(jnp.sum(e, axis=0, keepdims=True), approx=True)
    attn_ref[0] = a                                          # one contiguous store

    # weighted sum over neighbors + fc2 + residual
    res_mid = jnp.sum(a * (vv_ref[0] + pos3), axis=0)        # (TN, D)
    res_ref[0] = (jnp.dot(res_mid, w2_ref[...], preferred_element_type=jnp.float32)
                  + b2_ref[...] + pre_ref[0])


def _attention(relpos, q, kk, vv, pre, w, tile_n):
    B, K, Np, D = kk.shape
    P = pre.shape[2]
    grid = (B, Np // tile_n)
    w2d = lambda b, nt: (0, 0)
    return pl.pallas_call(
        _attn_kernel,
        out_shape=(jax.ShapeDtypeStruct((B, Np, P), jnp.float32),
                   jax.ShapeDtypeStruct((B, K, Np, D), jnp.float32)),
        grid=grid,
        in_specs=[
            pl.BlockSpec((1, K, tile_n, 3), lambda b, nt: (b, 0, nt, 0)),
            pl.BlockSpec((1, tile_n, D), lambda b, nt: (b, nt, 0)),
            pl.BlockSpec((1, K, tile_n, D), lambda b, nt: (b, 0, nt, 0)),
            pl.BlockSpec((1, K, tile_n, D), lambda b, nt: (b, 0, nt, 0)),
            pl.BlockSpec((1, tile_n, P), lambda b, nt: (b, nt, 0)),
            pl.BlockSpec((3, D), w2d), pl.BlockSpec((1, D), w2d),   # wd1, bd1
            pl.BlockSpec((D, D), w2d), pl.BlockSpec((1, D), w2d),   # wd2, bd2
            pl.BlockSpec((D, D), w2d), pl.BlockSpec((1, D), w2d),   # wg1, bg1
            pl.BlockSpec((D, D), w2d), pl.BlockSpec((1, D), w2d),   # wg2*, bg2*
            pl.BlockSpec((D, P), w2d), pl.BlockSpec((1, P), w2d),   # w2, b2
        ],
        out_specs=[
            pl.BlockSpec((1, tile_n, P), lambda b, nt: (b, nt, 0)),
            pl.BlockSpec((1, K, tile_n, D), lambda b, nt: (b, 0, nt, 0)),
        ],
        compiler_params=pltpu.CompilerParams(
            dimension_semantics=("parallel", "parallel")),
    )(relpos, q, kk, vv, pre,
      w['wd1'], w['bd1'], w['wd2'], w['bd2'],
      w['wg1'], w['bg1'], w['wg2'], w['bg2'],
      w['w2'], w['b2'])


# ---------------------------------------------------------------------------
# Full forward (JAX glue: k-NN top_k + gathers; everything heavy is in Pallas)
# ---------------------------------------------------------------------------
def transformer_block_forward(params, xyz, features, k_nn):
    B, N, P = features.shape
    D = params['wq'].shape[0]
    K = k_nn

    # fold fc1 into the fused q/k/v projection (no activation between them)
    w_qkv = jnp.concatenate([params['wq'], params['wk'], params['wv']], axis=1)
    w_fold = params['w1'] @ w_qkv                      # (P, 3D)
    b_fold = params['b1'] @ w_qkv                      # (1, 3D)

    # fold the 1/sqrt(D) softmax temperature into fc_gamma's second layer
    inv_sqrt_d = 1.0 / jnp.sqrt(jnp.float32(D))
    kernel2_w = dict(
        wd1=params['wd1'], bd1=params['bd1'], wd2=params['wd2'], bd2=params['bd2'],
        wg1=params['wg1'], bg1=params['bg1'],
        wg2=params['wg2'] * inv_sqrt_d, bg2=params['bg2'] * inv_sqrt_d,
        w2=params['w2'], b2=params['b2'])

    # k-NN selection + neighbor-major gathers (stay in plain JAX)
    knn_idx = _knn_indices(xyz, K)                     # (B, N, K)
    knn_idx_nm = jnp.transpose(knn_idx, (0, 2, 1))     # (B, K, N) -- tiny int transpose

    tile_n, n_pad = _pick_tile_n(N, K, D)

    feats_p = _pad_to(features, 1, n_pad)
    qkv = _projections(feats_p, w_fold, b_fold, tile_n)        # (B, n_pad, 3D)
    q = qkv[:, :, :D]                                          # (B, n_pad, D)
    ks = qkv[:, :, D:2 * D]
    vs = qkv[:, :, 2 * D:]

    # gather straight into neighbor-major (B, K, N, ·): no big HBM transposes
    kk = _index_points(ks, knn_idx_nm)                          # (B, K, N, D)
    vv = _index_points(vs, knn_idx_nm)                          # (B, K, N, D)
    knn_xyz = _index_points(xyz, knn_idx_nm)                    # (B, K, N, 3)
    relpos = xyz[:, None, :, :] - knn_xyz                       # (B, K, N, 3)

    kk = _pad_to(kk, 2, n_pad)
    vv = _pad_to(vv, 2, n_pad)
    relpos = _pad_to(relpos, 2, n_pad)

    res_p, attn_nm = _attention(relpos, q, kk, vv, feats_p, kernel2_w, tile_n)

    res = res_p[:, :N]
    # module's return layout is (B, N, K, D); this is the only remaining transpose
    attn = jnp.transpose(attn_nm[:, :, :N, :], (0, 2, 1, 3))
    return res, attn


# ---------------------------------------------------------------------------
# Pure-JAX reference (mirrors the PyTorch forward) for verification
# ---------------------------------------------------------------------------
def reference_forward(params, xyz, features, k_nn):
    knn_idx = _knn_indices(xyz, k_nn)
    knn_xyz = _index_points(xyz, knn_idx)
    pre = features
    x = features @ params['w1'] + params['b1']
    q = x @ params['wq']
    k = _index_points(x @ params['wk'], knn_idx)
    v = _index_points(x @ params['wv'], knn_idx)
    rel = xyz[:, :, None, :] - knn_xyz
    pos_enc = (jnp.maximum(rel @ params['wd1'] + params['bd1'], 0.0)
               @ params['wd2'] + params['bd2'])
    pre_attn = q[:, :, None, :] - k + pos_enc
    attn = (jnp.maximum(pre_attn @ params['wg1'] + params['bg1'], 0.0)
            @ params['wg2'] + params['bg2'])
    attn = jax.nn.softmax(attn / jnp.sqrt(jnp.float32(attn.shape[-1])), axis=-2)
    res = jnp.einsum('bmnf,bmnf->bmf', attn, v + pos_enc)
    res = res @ params['w2'] + params['b2'] + pre
    return res, attn


def init_params(key, d_points, d_model):
    keys = jax.random.split(key, 15)

    def lin(k, fan_in, shape):
        return jax.random.normal(k, shape, jnp.float32) * (1.0 / jnp.sqrt(jnp.float32(fan_in)))

    return dict(
        w1=lin(keys[0], d_points, (d_points, d_model)),
        b1=jax.random.normal(keys[1], (1, d_model), jnp.float32) * 0.01,
        w2=lin(keys[2], d_model, (d_model, d_points)),
        b2=jax.random.normal(keys[3], (1, d_points), jnp.float32) * 0.01,
        wd1=lin(keys[4], 3, (3, d_model)),
        bd1=jax.random.normal(keys[5], (1, d_model), jnp.float32) * 0.01,
        wd2=lin(keys[6], d_model, (d_model, d_model)),
        bd2=jax.random.normal(keys[7], (1, d_model), jnp.float32) * 0.01,
        wg1=lin(keys[8], d_model, (d_model, d_model)),
        bg1=jax.random.normal(keys[9], (1, d_model), jnp.float32) * 0.01,
        wg2=lin(keys[10], d_model, (d_model, d_model)),
        bg2=jax.random.normal(keys[11], (1, d_model), jnp.float32) * 0.01,
        wq=lin(keys[12], d_model, (d_model, d_model)),
        wk=lin(keys[13], d_model, (d_model, d_model)),
        wv=lin(keys[14], d_model, (d_model, d_model)),
    )


if __name__ == "__main__":
    B, N, d_points, d_model, k_nn = 2, 16, 8, 32, 4

    key = jax.random.PRNGKey(0)
    kp, kx, kf = jax.random.split(key, 3)
    params = init_params(kp, d_points, d_model)
    xyz = jax.random.normal(kx, (B, N, 3), jnp.float32)
    features = jax.random.normal(kf, (B, N, d_points), jnp.float32)

    fwd = jax.jit(transformer_block_forward, static_argnums=(3,))
    res, attn = fwd(params, xyz, features, k_nn)
    res = jax.block_until_ready(res)
    attn = jax.block_until_ready(attn)

    res_ref, attn_ref = reference_forward(params, xyz, features, k_nn)
    assert res.shape == (B, N, d_points) and attn.shape == (B, N, k_nn, d_model)
    # tolerance relaxed slightly vs 1e-4: fc1/scale folding + approx EUP reciprocal
    assert jnp.allclose(res, res_ref, atol=5e-3, rtol=5e-3), \
        float(jnp.max(jnp.abs(res - res_ref)))
    assert jnp.allclose(attn, attn_ref, atol=5e-3, rtol=5e-3), \
        float(jnp.max(jnp.abs(attn - attn_ref)))

    print("KERNEL_OK")
</pallas_src>

<mosaic_0001>
module attributes {stable_mosaic.version = 11 : i64} {
  func.func @_proj_kernel(%arg0: i32, %arg1: i32, %arg2: memref<1x16x8xf32, #tpu.memory_space<vmem>>, %arg3: memref<8x96xf32, #tpu.memory_space<vmem>>, %arg4: memref<1x96xf32, #tpu.memory_space<vmem>>, %arg5: memref<1x16x96xf32, #tpu.memory_space<vmem>>) attributes {dimension_semantics = [#tpu.dimension_semantics<parallel>, #tpu.dimension_semantics<parallel>], iteration_bounds = array<i64: 2, 1>, scalar_prefetch = 0 : i64, scratch_operands = 0 : i64, tpu.core_type = #tpu.core_type<tc>, window_params = [{transform_indices = @transform_0, window_bounds = array<i64: 1, 16, 8>}, {pipeline_mode = #tpu.pipeline_mode<synchronous>, transform_indices = @transform_1, window_bounds = array<i64: 8, 96>}, {pipeline_mode = #tpu.pipeline_mode<synchronous>, transform_indices = @transform_2, window_bounds = array<i64: 1, 96>}, {transform_indices = @transform_3, window_bounds = array<i64: 1, 16, 96>}]} {
    %c0 = arith.constant 0 : index
    %c0_0 = arith.constant 0 : index
    %c0_1 = arith.constant 0 : index
    %0 = vector.load %arg2[%c0, %c0_0, %c0_1] : memref<1x16x8xf32, #tpu.memory_space<vmem>>, vector<1x16x8xf32>
    %1 = vector.shape_cast %0 : vector<1x16x8xf32> to vector<16x8xf32>
    %c0_2 = arith.constant 0 : index
    %c0_3 = arith.constant 0 : index
    %2 = vector.load %arg3[%c0_2, %c0_3] : memref<8x96xf32, #tpu.memory_space<vmem>>, vector<8x96xf32>
    %cst = arith.constant dense<0.000000e+00> : vector<16x96xf32>
    %3 = tpu.matmul %1, %2, %cst {dimension_numbers = #tpu.dot_dimension_numbers<[1], [0], [0], [1], [0, 0, 1, 1], [], []>} : vector<16x8xf32>, vector<8x96xf32>, vector<16x96xf32> -> vector<16x96xf32>
    %c0_4 = arith.constant 0 : index
    %c0_5 = arith.constant 0 : index
    %4 = vector.load %arg4[%c0_4, %c0_5] : memref<1x96xf32, #tpu.memory_space<vmem>>, vector<1x96xf32>
    %5 = vector.broadcast %4 : vector<1x96xf32> to vector<16x96xf32>
    %6 = arith.addf %3, %5 : vector<16x96xf32>
    %c0_6 = arith.constant 0 : index
    %c0_7 = arith.constant 0 : index
    %c0_8 = arith.constant 0 : index
    %7 = vector.load %arg5[%c0_6, %c0_7, %c0_8] : memref<1x16x96xf32, #tpu.memory_space<vmem>>, vector<1x16x96xf32>
    %8 = vector.shape_cast %7 : vector<1x16x96xf32> to vector<16x96xf32>
    %9 = vector.shape_cast %6 : vector<16x96xf32> to vector<1x16x96xf32>
    tpu.vector_store %arg5[%c0_6, %c0_7, %c0_8], %9 {strides = array<i32>} : memref<1x16x96xf32, #tpu.memory_space<vmem>>, vector<1x16x96xf32>,
    return
  }
  func.func @transform_0(%arg0: i32, %arg1: i32) -> (i32, i32, i32) {
    %c0_i32 = arith.constant 0 : i32
    %c0_i32_0 = arith.constant 0 : i32
    return %arg0, %arg1, %c0_i32 : i32, i32, i32
  }
  func.func @transform_1(%arg0: i32, %arg1: i32) -> (i32, i32) {
    %c0_i32 = arith.constant 0 : i32
    %c0_i32_0 = arith.constant 0 : i32
    %c0_i32_1 = arith.constant 0 : i32
    return %c0_i32, %c0_i32_0 : i32, i32
  }
  func.func @transform_2(%arg0: i32, %arg1: i32) -> (i32, i32) {
    %c0_i32 = arith.constant 0 : i32
    %c0_i32_0 = arith.constant 0 : i32
    %c0_i32_1 = arith.constant 0 : i32
    return %c0_i32, %c0_i32_0 : i32, i32
  }
  func.func @transform_3(%arg0: i32, %arg1: i32) -> (i32, i32, i32) {
    %c0_i32 = arith.constant 0 : i32
    %c0_i32_0 = arith.constant 0 : i32
    return %arg0, %arg1, %c0_i32 : i32, i32, i32
  }
}

module attributes {stable_mosaic.version = 11 : i64} {
  func.func @_attn_kernel(%arg0: i32, %arg1: i32, %arg2: memref<1x4x16x3xf32, #tpu.memory_space<vmem>>, %arg3: memref<1x16x32xf32, #tpu.memory_space<vmem>>, %arg4: memref<1x4x16x32xf32, #tpu.memory_space<vmem>>, %arg5: memref<1x4x16x32xf32, #tpu.memory_space<vmem>>, %arg6: memref<1x16x8xf32, #tpu.memory_space<vmem>>, %arg7: memref<3x32xf32, #tpu.memory_space<vmem>>, %arg8: memref<1x32xf32, #tpu.memory_space<vmem>>, %arg9: memref<32x32xf32, #tpu.memory_space<vmem>>, %arg10: memref<1x32xf32, #tpu.memory_space<vmem>>, %arg11: memref<32x32xf32, #tpu.memory_space<vmem>>, %arg12: memref<1x32xf32, #tpu.memory_space<vmem>>, %arg13: memref<32x32xf32, #tpu.memory_space<vmem>>, %arg14: memref<1x32xf32, #tpu.memory_space<vmem>>, %arg15: memref<32x8xf32, #tpu.memory_space<vmem>>, %arg16: memref<1x8xf32, #tpu.memory_space<vmem>>, %arg17: memref<1x16x8xf32, #tpu.memory_space<vmem>>, %arg18: memref<1x4x16x32xf32, #tpu.memory_space<vmem>>) attributes {dimension_semantics = [#tpu.dimension_semantics<parallel>, #tpu.dimension_semantics<parallel>], iteration_bounds = array<i64: 2, 1>, scalar_prefetch = 0 : i64, scratch_operands = 0 : i64, tpu.core_type = #tpu.core_type<tc>, window_params = [{transform_indices = @transform_0, window_bounds = array<i64: 1, 4, 16, 3>}, {transform_indices = @transform_1, window_bounds = array<i64: 1, 16, 32>}, {transform_indices = @transform_2, window_bounds = array<i64: 1, 4, 16, 32>}, {transform_indices = @transform_3, window_bounds = array<i64: 1, 4, 16, 32>}, {transform_indices = @transform_4, window_bounds = array<i64: 1, 16, 8>}, {pipeline_mode = #tpu.pipeline_mode<synchronous>, transform_indices = @transform_5, window_bounds = array<i64: 3, 32>}, {pipeline_mode = #tpu.pipeline_mode<synchronous>, transform_indices = @transform_6, window_bounds = array<i64: 1, 32>}, {pipeline_mode = #tpu.pipeline_mode<synchronous>, transform_indices = @transform_7, window_bounds = array<i64: 32, 32>}, {pipeline_mode = #tpu.pipeline_mode<synchronous>, transform_indices = @transform_8, window_bounds = array<i64: 1, 32>}, {pipeline_mode = #tpu.pipeline_mode<synchronous>, transform_indices = @transform_9, window_bounds = array<i64: 32, 32>}, {pipeline_mode = #tpu.pipeline_mode<synchronous>, transform_indices = @transform_10, window_bounds = array<i64: 1, 32>}, {pipeline_mode = #tpu.pipeline_mode<synchronous>, transform_indices = @transform_11, window_bounds = array<i64: 32, 32>}, {pipeline_mode = #tpu.pipeline_mode<synchronous>, transform_indices = @transform_12, window_bounds = array<i64: 1, 32>}, {pipeline_mode = #tpu.pipeline_mode<synchronous>, transform_indices = @transform_13, window_bounds = array<i64: 32, 8>}, {pipeline_mode = #tpu.pipeline_mode<synchronous>, transform_indices = @transform_14, window_bounds = array<i64: 1, 8>}, {transform_indices = @transform_15, window_bounds = array<i64: 1, 16, 8>}, {transform_indices = @transform_16, window_bounds = array<i64: 1, 4, 16, 32>}]} {
    %c0 = arith.constant 0 : index
    %c0_0 = arith.constant 0 : index
    %c0_1 = arith.constant 0 : index
    %c0_2 = arith.constant 0 : index
    %0 = vector.load %arg2[%c0, %c0_0, %c0_1, %c0_2] : memref<1x4x16x3xf32, #tpu.memory_space<vmem>>, vector<1x4x16x3xf32>
    %1 = vector.shape_cast %0 : vector<1x4x16x3xf32> to vector<4x16x3xf32>
    %2 = vector.shape_cast %1 : vector<4x16x3xf32> to vector<64x3xf32>
    %c0_3 = arith.constant 0 : index
    %c0_4 = arith.constant 0 : index
    %3 = vector.load %arg7[%c0_3, %c0_4] : memref<3x32xf32, #tpu.memory_space<vmem>>, vector<3x32xf32>
    %cst = arith.constant dense<0.000000e+00> : vector<64x32xf32>
    %4 = tpu.matmul %2, %3, %cst {dimension_numbers = #tpu.dot_dimension_numbers<[1], [0], [0], [1], [0, 0, 1, 1], [], []>} : vector<64x3xf32>, vector<3x32xf32>, vector<64x32xf32> -> vector<64x32xf32>
    %c0_5 = arith.constant 0 : index
    %c0_6 = arith.constant 0 : index
    %5 = vector.load %arg8[%c0_5, %c0_6] : memref<1x32xf32, #tpu.memory_space<vmem>>, vector<1x32xf32>
    %6 = vector.broadcast %5 : vector<1x32xf32> to vector<64x32xf32>
    %7 = arith.addf %4, %6 : vector<64x32xf32>
    %cst_7 = arith.constant 0.000000e+00 : f32
    %8 = vector.broadcast %cst_7 : f32 to vector<64x32xf32>
    %9 = arith.maximumf %7, %8 : vector<64x32xf32>
    %c0_8 = arith.constant 0 : index
    %c0_9 = arith.constant 0 : index
    %10 = vector.load %arg9[%c0_8, %c0_9] : memref<32x32xf32, #tpu.memory_space<vmem>>, vector<32x32xf32>
    %cst_10 = arith.constant dense<0.000000e+00> : vector<64x32xf32>
    %11 = tpu.matmul %9, %10, %cst_10 {dimension_numbers = #tpu.dot_dimension_numbers<[1], [0], [0], [1], [0, 0, 1, 1], [], []>} : vector<64x32xf32>, vector<32x32xf32>, vector<64x32xf32> -> vector<64x32xf32>
    %c0_11 = arith.constant 0 : index
    %c0_12 = arith.constant 0 : index
    %12 = vector.load %arg10[%c0_11, %c0_12] : memref<1x32xf32, #tpu.memory_space<vmem>>, vector<1x32xf32>
    %13 = vector.broadcast %12 : vector<1x32xf32> to vector<64x32xf32>
    %14 = arith.addf %11, %13 : vector<64x32xf32>
    %15 = vector.shape_cast %14 : vector<64x32xf32> to vector<4x16x32xf32>
    %c0_13 = arith.constant 0 : index
    %c0_14 = arith.constant 0 : index
    %c0_15 = arith.constant 0 : index
    %16 = vector.load %arg3[%c0_13, %c0_14, %c0_15] : memref<1x16x32xf32, #tpu.memory_space<vmem>>, vector<1x16x32xf32>
    %17 = vector.shape_cast %16 : vector<1x16x32xf32> to vector<16x32xf32>
    %18 = vector.shape_cast %17 : vector<16x32xf32> to vector<1x16x32xf32>
    %c0_16 = arith.constant 0 : index
    %c0_17 = arith.constant 0 : index
    %c0_18 = arith.constant 0 : index
    %c0_19 = arith.constant 0 : index
    %19 = vector.load %arg4[%c0_16, %c0_17, %c0_18, %c0_19] : memref<1x4x16x32xf32, #tpu.memory_space<vmem>>, vector<1x4x16x32xf32>
    %20 = vector.shape_cast %19 : vector<1x4x16x32xf32> to vector<4x16x32xf32>
    %21 = vector.broadcast %18 : vector<1x16x32xf32> to vector<4x16x32xf32>
    %22 = arith.subf %21, %20 : vector<4x16x32xf32>
    %23 = arith.addf %22, %15 : vector<4x16x32xf32>
    %24 = vector.shape_cast %23 : vector<4x16x32xf32> to vector<64x32xf32>
    %c0_20 = arith.constant 0 : index
    %c0_21 = arith.constant 0 : index
    %25 = vector.load %arg11[%c0_20, %c0_21] : memref<32x32xf32, #tpu.memory_space<vmem>>, vector<32x32xf32>
    %cst_22 = arith.constant dense<0.000000e+00> : vector<64x32xf32>
    %26 = tpu.matmul %24, %25, %cst_22 {dimension_numbers = #tpu.dot_dimension_numbers<[1], [0], [0], [1], [0, 0, 1, 1], [], []>} : vector<64x32xf32>, vector<32x32xf32>, vector<64x32xf32> -> vector<64x32xf32>
    %c0_23 = arith.constant 0 : index
    %c0_24 = arith.constant 0 : index
    %27 = vector.load %arg12[%c0_23, %c0_24] : memref<1x32xf32, #tpu.memory_space<vmem>>, vector<1x32xf32>
    %28 = vector.broadcast %27 : vector<1x32xf32> to vector<64x32xf32>
    %29 = arith.addf %26, %28 : vector<64x32xf32>
    %cst_25 = arith.constant 0.000000e+00 : f32
    %30 = vector.broadcast %cst_25 : f32 to vector<64x32xf32>
    %31 = arith.maximumf %29, %30 : vector<64x32xf32>
    %c0_26 = arith.constant 0 : index
    %c0_27 = arith.constant 0 : index
    %32 = vector.load %arg13[%c0_26, %c0_27] : memref<32x32xf32, #tpu.memory_space<vmem>>, vector<32x32xf32>
    %cst_28 = arith.constant dense<0.000000e+00> : vector<64x32xf32>
    %33 = tpu.matmul %31, %32, %cst_28 {dimension_numbers = #tpu.dot_dimension_numbers<[1], [0], [0], [1], [0, 0, 1, 1], [], []>} : vector<64x32xf32>, vector<32x32xf32>, vector<64x32xf32> -> vector<64x32xf32>
    %c0_29 = arith.constant 0 : index
    %c0_30 = arith.constant 0 : index
    %34 = vector.load %arg14[%c0_29, %c0_30] : memref<1x32xf32, #tpu.memory_space<vmem>>, vector<1x32xf32>
    %35 = vector.broadcast %34 : vector<1x32xf32> to vector<64x32xf32>
    %36 = arith.addf %33, %35 : vector<64x32xf32>
    %37 = vector.shape_cast %36 : vector<64x32xf32> to vector<4x16x32xf32>
    %cst_31 = arith.constant dense<0xFF800000> : vector<16x32xf32>
    %38 = vector.multi_reduction <maximumf>, %37, %cst_31 [0] : vector<4x16x32xf32> to vector<16x32xf32>
    %39 = vector.shape_cast %38 : vector<16x32xf32> to vector<1x16x32xf32>
    %40 = vector.broadcast %39 : vector<1x16x32xf32> to vector<4x16x32xf32>
    %41 = arith.subf %37, %40 : vector<4x16x32xf32>
    %42 = math.exp %41 : vector<4x16x32xf32>
    %cst_32 = arith.constant dense<0.000000e+00> : vector<16x32xf32>
    %43 = vector.multi_reduction <add>, %42, %cst_32 [0] : vector<4x16x32xf32> to vector<16x32xf32>
    %44 = vector.shape_cast %43 : vector<16x32xf32> to vector<1x16x32xf32>
    %45 = tpu.reciprocal %44 {approx = true} : vector<1x16x32xf32> -> vector<1x16x32xf32>
    %46 = vector.broadcast %45 : vector<1x16x32xf32> to vector<4x16x32xf32>
    %47 = arith.mulf %42, %46 : vector<4x16x32xf32>
    %c0_33 = arith.constant 0 : index
    %c0_34 = arith.constant 0 : index
    %c0_35 = arith.constant 0 : index
    %c0_36 = arith.constant 0 : index
    %48 = vector.load %arg18[%c0_33, %c0_34, %c0_35, %c0_36] : memref<1x4x16x32xf32, #tpu.memory_space<vmem>>, vector<1x4x16x32xf32>
    %49 = vector.shape_cast %48 : vector<1x4x16x32xf32> to vector<4x16x32xf32>
    %50 = vector.shape_cast %47 : vector<4x16x32xf32> to vector<1x4x16x32xf32>
    tpu.vector_store %arg18[%c0_33, %c0_34, %c0_35, %c0_36], %50 {strides = array<i32>} : memref<1x4x16x32xf32, #tpu.memory_space<vmem>>, vector<1x4x16x32xf32>,
    %c0_37 = arith.constant 0 : index
    %c0_38 = arith.constant 0 : index
    %c0_39 = arith.constant 0 : index
    %c0_40 = arith.constant 0 : index
    %51 = vector.load %arg5[%c0_37, %c0_38, %c0_39, %c0_40] : memref<1x4x16x32xf32, #tpu.memory_space<vmem>>, vector<1x4x16x32xf32>
    %52 = vector.shape_cast %51 : vector<1x4x16x32xf32> to vector<4x16x32xf32>
    %53 = arith.addf %52, %15 : vector<4x16x32xf32>
    %54 = arith.mulf %47, %53 : vector<4x16x32xf32>
    %cst_41 = arith.constant dense<0.000000e+00> : vector<16x32xf32>
    %55 = vector.multi_reduction <add>, %54, %cst_41 [0] : vector<4x16x32xf32> to vector<16x32xf32>
    %c0_42 = arith.constant 0 : index
    %c0_43 = arith.constant 0 : index
    %56 = vector.load %arg15[%c0_42, %c0_43] : memref<32x8xf32, #tpu.memory_space<vmem>>, vector<32x8xf32>
    %cst_44 = arith.constant dense<0.000000e+00> : vector<16x8xf32>
    %57 = tpu.matmul %55, %56, %cst_44 {dimension_numbers = #tpu.dot_dimension_numbers<[1], [0], [0], [1], [0, 0, 1, 1], [], []>} : vector<16x32xf32>, vector<32x8xf32>, vector<16x8xf32> -> vector<16x8xf32>
    %c0_45 = arith.constant 0 : index
    %c0_46 = arith.constant 0 : index
    %58 = vector.load %arg16[%c0_45, %c0_46] : memref<1x8xf32, #tpu.memory_space<vmem>>, vector<1x8xf32>
    %59 = vector.broadcast %58 : vector<1x8xf32> to vector<16x8xf32>
    %60 = arith.addf %57, %59 : vector<16x8xf32>
    %c0_47 = arith.constant 0 : index
    %c0_48 = arith.constant 0 : index
    %c0_49 = arith.constant 0 : index
    %61 = vector.load %arg6[%c0_47, %c0_48, %c0_49] : memref<1x16x8xf32, #tpu.memory_space<vmem>>, vector<1x16x8xf32>
    %62 = vector.shape_cast %61 : vector<1x16x8xf32> to vector<16x8xf32>
    %63 = arith.addf %60, %62 : vector<16x8xf32>
    %c0_50 = arith.constant 0 : index
    %c0_51 = arith.constant 0 : index
    %c0_52 = arith.constant 0 : index
    %64 = vector.load %arg17[%c0_50, %c0_51, %c0_52] : memref<1x16x8xf32, #tpu.memory_space<vmem>>, vector<1x16x8xf32>
    %65 = vector.shape_cast %64 : vector<1x16x8xf32> to vector<16x8xf32>
    %66 = vector.shape_cast %63 : vector<16x8xf32> to vector<1x16x8xf32>
    tpu.vector_store %arg17[%c0_50, %c0_51, %c0_52], %66 {strides = array<i32>} : memref<1x16x8xf32, #tpu.memory_space<vmem>>, vector<1x16x8xf32>,
    return
  }
  func.func @transform_0(%arg0: i32, %arg1: i32) -> (i32, i32, i32, i32) {
    %c0_i32 = arith.constant 0 : i32
    %c0_i32_0 = arith.constant 0 : i32
    %c0_i32_1 = arith.constant 0 : i32
    return %arg0, %c0_i32, %arg1, %c0_i32_0 : i32, i32, i32, i32
  }
  func.func @transform_1(%arg0: i32, %arg1: i32) -> (i32, i32, i32) {
    %c0_i32 = arith.constant 0 : i32
    %c0_i32_0 = arith.constant 0 : i32
    return %arg0, %arg1, %c0_i32 : i32, i32, i32
  }
  func.func @transform_2(%arg0: i32, %arg1: i32) -> (i32, i32, i32, i32) {
    %c0_i32 = arith.constant 0 : i32
    %c0_i32_0 = arith.constant 0 : i32
    %c0_i32_1 = arith.constant 0 : i32
    return %arg0, %c0_i32, %arg1, %c0_i32_0 : i32, i32, i32, i32
  }
  func.func @transform_3(%arg0: i32, %arg1: i32) -> (i32, i32, i32, i32) {
    %c0_i32 = arith.constant 0 : i32
    %c0_i32_0 = arith.constant 0 : i32
    %c0_i32_1 = arith.constant 0 : i32
    return %arg0, %c0_i32, %arg1, %c0_i32_0 : i32, i32, i32, i32
  }
  func.func @transform_4(%arg0: i32, %arg1: i32) -> (i32, i32, i32) {
    %c0_i32 = arith.constant 0 : i32
    %c0_i32_0 = arith.constant 0 : i32
    return %arg0, %arg1, %c0_i32 : i32, i32, i32
  }
  func.func @transform_5(%arg0: i32, %arg1: i32) -> (i32, i32) {
    %c0_i32 = arith.constant 0 : i32
    %c0_i32_0 = arith.constant 0 : i32
    %c0_i32_1 = arith.constant 0 : i32
    return %c0_i32, %c0_i32_0 : i32, i32
  }
  func.func @transform_6(%arg0: i32, %arg1: i32) -> (i32, i32) {
    %c0_i32 = arith.constant 0 : i32
    %c0_i32_0 = arith.constant 0 : i32
    %c0_i32_1 = arith.constant 0 : i32
    return %c0_i32, %c0_i32_0 : i32, i32
  }
  func.func @transform_7(%arg0: i32, %arg1: i32) -> (i32, i32) {
    %c0_i32 = arith.constant 0 : i32
    %c0_i32_0 = arith.constant 0 : i32
    %c0_i32_1 = arith.constant 0 : i32
    return %c0_i32, %c0_i32_0 : i32, i32
  }
  func.func @transform_8(%arg0: i32, %arg1: i32) -> (i32, i32) {
    %c0_i32 = arith.constant 0 : i32
    %c0_i32_0 = arith.constant 0 : i32
    %c0_i32_1 = arith.constant 0 : i32
    return %c0_i32, %c0_i32_0 : i32, i32
  }
  func.func @transform_9(%arg0: i32, %arg1: i32) -> (i32, i32) {
    %c0_i32 = arith.constant 0 : i32
    %c0_i32_0 = arith.constant 0 : i32
    %c0_i32_1 = arith.constant 0 : i32
    return %c0_i32, %c0_i32_0 : i32, i32
  }
  func.func @transform_10(%arg0: i32, %arg1: i32) -> (i32, i32) {
    %c0_i32 = arith.constant 0 : i32
    %c0_i32_0 = arith.constant 0 : i32
    %c0_i32_1 = arith.constant 0 : i32
    return %c0_i32, %c0_i32_0 : i32, i32
  }
  func.func @transform_11(%arg0: i32, %arg1: i32) -> (i32, i32) {
    %c0_i32 = arith.constant 0 : i32
    %c0_i32_0 = arith.constant 0 : i32
    %c0_i32_1 = arith.constant 0 : i32
    return %c0_i32, %c0_i32_0 : i32, i32
  }
  func.func @transform_12(%arg0: i32, %arg1: i32) -> (i32, i32) {
    %c0_i32 = arith.constant 0 : i32
    %c0_i32_0 = arith.constant 0 : i32
    %c0_i32_1 = arith.constant 0 : i32
    return %c0_i32, %c0_i32_0 : i32, i32
  }
  func.func @transform_13(%arg0: i32, %arg1: i32) -> (i32, i32) {
    %c0_i32 = arith.constant 0 : i32
    %c0_i32_0 = arith.constant 0 : i32
    %c0_i32_1 = arith.constant 0 : i32
    return %c0_i32, %c0_i32_0 : i32, i32
  }
  func.func @transform_14(%arg0: i32, %arg1: i32) -> (i32, i32) {
    %c0_i32 = arith.constant 0 : i32
    %c0_i32_0 = arith.constant 0 : i32
    %c0_i32_1 = arith.constant 0 : i32
    return %c0_i32, %c0_i32_0 : i32, i32
  }
  func.func @transform_15(%arg0: i32, %arg1: i32) -> (i32, i32, i32) {
    %c0_i32 = arith.constant 0 : i32
    %c0_i32_0 = arith.constant 0 : i32
    return %arg0, %arg1, %c0_i32 : i32, i32, i32
  }
  func.func @transform_16(%arg0: i32, %arg1: i32) -> (i32, i32, i32, i32) {
    %c0_i32 = arith.constant 0 : i32
    %c0_i32_0 = arith.constant 0 : i32
    %c0_i32_1 = arith.constant 0 : i32
    return %arg0, %c0_i32, %arg1, %c0_i32_0 : i32, i32, i32, i32
  }
}

</mosaic_0001>

<bundles_post_ra>
// kernel: transformer_block_forward.2
= control target key start
LH: loop header
LB: loop body
LE: loop exit
PB: predicated region body
PF: predicated region fallthrough
CT: control target
= control target key end

     0   :  { %s484_s12 = smov 0   ;;  %s486_s13 = smov 0   ;;  %s520_s0 = inlined_call_operand.vmem [shape: f32[2,16,8], index: 0, kind: input, shape index: {}]   ;;  %s521_s1 = inlined_call_operand.vmem [shape: f32[8,96], index: 1, kind: input, shape index: {}]   ;;  %s522_s2 = inlined_call_operand.vmem [shape: f32[1,96], index: 2, kind: input, shape index: {}]   ;;  %s523_s3 = inlined_call_operand.vmem [shape: f32[2,16,96], index: 3, kind: output, shape index: {}]  }
   0x1   :  { %s488_s14 = smov 0  }
   0x2 LB: > { %s25_s15 = sadd.s32 1, %s458_s13  ;;  %p396_p0 = scmp.ge.s32.totalorder %s462_s14, 1  ;;  %s462_s14 = sphi %s488_s14, %s13_s14   ;;  %s458_s13 = sphi %s486_s13, %s525_s13   ;;  %s454_s12 = sphi %s484_s12, %s524_s12  }
   0x3   : > { %p27_p1 = scmp.ge.s32.totalorder %s25_s15, 2  ;;  %p158_p2 = scmp.lt.s32.totalorder %s462_s14, 3 }
   0x5   : > { %s527_s15 = smov (%p27_p1, %s25_s15), 0  ;;  %p159_p3 = pnand %p396_p0, %p158_p2 }
   0x6   : > { %v212_v0 = vld [vmem:[%s521_s1] sm:$0xff] (!%p159_p3)  ;;  %p191_p4 = scmp.lt.s32.totalorder (!%p159_p3), %s454_s12, 1  ;;  %vm220_vm0 = vcmask (!%p159_p3), 64512   ;;  %vm302_vm1 = vcmask (!%p159_p3), 785408  }
   0x7   : > { %162 = sbr.rel (%p159_p3) target bundleno = 235 (0xeb), region = 32  ;;  %411 = vmatprep.subr.mxu0 (!%p159_p3), %v212_v0  ;;  %v401_v3 = vld [vmem:[%s522_s2] ss:$0 sm:$0xff] (!%p159_p3) }
   0x8   : > { %412 = vmatpush3.msra.mxu0 (!%p159_p3), %v212_v0 }
   0xe   : > { %s529_s12 = smov (!%p191_p4, %s454_s12), 1 }
   0xf   : > { %s406_s18 = sshll.u32 %s529_s12, 4 }
  0x10   : > { %s198_s21 = scalar_lea.vmem %s520_s0, %s406_s18  ;;  %s208_s26 = scalar_lea.vmem %s523_s3, %s406_s18 }
  0x11   : > { %v210_v1 = vld [vmem:[%s198_s21] sm:$0xff]  ;;  %v211_v2 = vld [vmem:[%s198_s21 + $0x8] sm:$0xff] }
  0x12   : > { %413 = vmatprep.mubr.msk.f32.mxu0 %vm220_vm0, %v210_v1 }
  0x13   : > { %414 = vmatmul.mubr.msk.f32.vlgmr.msra.gmra.mrb[0].mxu0 %vm220_vm0, %v211_v2 }
  0xe6   : > { %v415_v4 = vpop.f32.mrb[0].mxu0 }
  0xe7   : > { %v299_v5 = vadd.f32 %v415_v4, %v401_v3  ;;  %v293_v6 = vpop.f32.mrb[1].mxu0 }
  0xe8   : > { %v294_v7 = vadd.f32 %v401_v3, %v293_v6 }
  0xe9   : > { %304 = vst.msk [vmem:[%s208_s26 + $0x8] sm:$0xff] %vm302_vm1, %v299_v5 }
  0xea   : > { %303 = vst.msk [vmem:[%s208_s26] sm:$0xff] %vm302_vm1, %v294_v7 }
  0xeb PF: > { %s13_s14 = sadd.s32 1, %s462_s14   ;;  %s524_s12 = smov %s458_s13 }
  0xec   : > { %p10_p5 = scmp.ge.s32.totalorder %s13_s14, 4   ;;  %s525_s13 = smov %s527_s15 }
  0xee   :  { %12 = sbr.rel (!%p10_p5) target bundleno = 2 (0x2), region = 62 }

// kernel: transformer_block_forward.3
= control target key start
LH: loop header
LB: loop body
LE: loop exit
PB: predicated region body
PF: predicated region fallthrough
CT: control target
= control target key end

     0   :  { %s2147_s21 = smov 0   ;;  %s2149_s22 = smov 0   ;;  %s2394_s0 = inlined_call_operand.vmem [shape: f32[2,4,16,3], index: 0, kind: input, shape index: {}]   ;;  %s2395_s1 = inlined_call_operand.vmem [shape: f32[2,16,32], index: 1, kind: input, shape index: {}]   ;;  %s2396_s2 = inlined_call_operand.vmem [shape: f32[2,4,16,32], index: 2, kind: input, shape index: {}]   ;;  %s2397_s3 = inlined_call_operand.vmem [shape: f32[2,4,16,32], index: 3, kind: input, shape index: {}]   ;;  %s2398_s4 = inlined_call_operand.vmem [shape: f32[2,16,8], index: 4, kind: input, shape index: {}]   ;;  %s2399_s5 = inlined_call_operand.vmem [shape: f32[3,32], index: 5, kind: input, shape index: {}]   ;;  %s2400_s6 = inlined_call_operand.vmem [shape: f32[1,32], index: 6, kind: input, shape index: {}]   ;;  %s2401_s7 = inlined_call_operand.vmem [shape: f32[32,32], index: 7, kind: input, shape index: {}]   ;;  %s2402_s8 = inlined_call_operand.vmem [shape: f32[1,32], index: 8, kind: input, shape index: {}]   ;;  %s2403_s9 = inlined_call_operand.vmem [shape: f32[32,32], index: 9, kind: input, shape index: {}]   ;;  %s2404_s10 = inlined_call_operand.vmem [shape: f32[1,32], index: 10, kind: input, shape index: {}]   ;;  %s2405_s11 = inlined_call_operand.vmem [shape: f32[32,32], index: 11, kind: input, shape index: {}]   ;;  %s2406_s12 = inlined_call_operand.vmem [shape: f32[1,32], index: 12, kind: input, shape index: {}]   ;;  %s2407_s13 = inlined_call_operand.vmem [shape: f32[32,8], index: 13, kind: input, shape index: {}]   ;;  %s2408_s14 = inlined_call_operand.vmem [shape: f32[1,8], index: 14, kind: input, shape index: {}]   ;;  %s2409_s15 = inlined_call_operand.vmem [shape: f32[2,16,8], index: 15, kind: output, shape index: {0}]   ;;  %s2410_s16 = inlined_call_operand.vmem [shape: f32[2,4,16,32], index: 16, kind: output, shape index: {1}]  }
   0x1   :  { %2411 = sst [smem:[#allocation2_spill]] %s2394_s0  ;;  %s2151_s23 = smov 0  }
   0x2 LB: > { %s39_s24 = sadd.s32 1, %s2056_s22  ;;  %p1762_p0 = scmp.ge.s32.totalorder %s2060_s23, 1  ;;  %s2060_s23 = sphi %s2151_s23, %s27_s23   ;;  %s2056_s22 = sphi %s2149_s22, %s2414_s22   ;;  %s2052_s21 = sphi %s2147_s21, %s2413_s21  }
   0x3   : > { %p41_p1 = scmp.ge.s32.totalorder %s39_s24, 2  ;;  %p556_p2 = scmp.lt.s32.totalorder %s2060_s23, 3 }
   0x5   : > { %s2416_s24 = smov (%p41_p1, %s39_s24), 0  ;;  %p557_p3 = pnand %p1762_p0, %p556_p2 }
   0x6   : > { %v737_v0 = vld [vmem:[%s2399_s5] sm:$0x7] (!%p557_p3)  ;;  %vm770_vm0 = vcmask (!%p557_p3), 1042432   ;;  %p660_p4 = scmp.lt.s32.totalorder (!%p557_p3), %s2052_s21, 1  ;;  %v888_v2 = vld [vmem:[%s2401_s7 + $0x8] sm:$0xff] (!%p557_p3)  ;;  %vm745_vm1 = vcmask (!%p557_p3), 23552  }
   0x7   : > { %560 = sbr.rel (%p557_p3) target bundleno = 1172 (0x494), region = 80  ;;  %v887_v1 = vld [vmem:[%s2401_s7] sm:$0xff] (!%p557_p3)  ;;  %1877 = vmatprep.subr.msk.mxu0 (!%p557_p3), %vm770_vm0, %v737_v0  ;;  %s2412_s19 = sld [smem:[#allocation2_spill]] (!%p557_p3)  ;;  %v889_v12 = vld [vmem:[%s2401_s7 + $0x10] sm:$0xff] (!%p557_p3)  ;;  %v890_v13 = vld [vmem:[%s2401_s7 + $0x18] sm:$0xff] (!%p557_p3)  ;;  %vm898_vm2 = vcmask (!%p557_p3), 261120  }
   0x8   : > { %1878 = vmatpush3.msk.msra.mxu0 (!%p557_p3), %vm770_vm0, %v737_v0  ;;  %v1962_v3 = vpack.c.bf16 (!%p557_p3), %v888_v2, %v887_v1  ;;  %v1966_v14 = vpack.c.bf16 (!%p557_p3), %v890_v13, %v889_v12  ;;  %v1054_v15 = vld [vmem:[%s2403_s9] sm:$0xff] (!%p557_p3)  ;;  %v1055_v16 = vld [vmem:[%s2403_s9 + $0x8] sm:$0xff] (!%p557_p3)  ;;  %v1056_v17 = vld [vmem:[%s2403_s9 + $0x10] sm:$0xff] (!%p557_p3)  ;;  %vm1546_vm3 = vcmask (!%p557_p3), 64512  }
   0x9   : > { %v1970_v18 = vpack.c.bf16 (!%p557_p3), %v1055_v16, %v1054_v15  ;;  %v1057_v19 = vld [vmem:[%s2403_s9 + $0x18] sm:$0xff] (!%p557_p3)  ;;  %v1777_v21 = vld [vmem:[%s2400_s6] ss:$0 sm:$0xff] (!%p557_p3)  ;;  %v1203_v47 = vld [vmem:[%s2405_s11 + $0x8] sm:$0xff] (!%p557_p3) }
   0xa   : > { %1963 = vmatprep.subr.bf16.mxu1 (!%p557_p3), %v1962_v3  ;;  %v1974_v20 = vpack.c.bf16 (!%p557_p3), %v1057_v19, %v1056_v17  ;;  %v1202_v46 = vld [vmem:[%s2405_s11] sm:$0xff] (!%p557_p3)  ;;  %v1204_v48 = vld [vmem:[%s2405_s11 + $0x10] sm:$0xff] (!%p557_p3)  ;;  %v1205_v50 = vld [vmem:[%s2405_s11 + $0x18] sm:$0xff] (!%p557_p3) }
   0xb   : > { %1965 = vmatpush3.bf16.msra.mxu1 (!%p557_p3), %v1962_v3  ;;  %1971 = vmatprep.subr.bf16.mxu0 (!%p557_p3), %v1970_v18  ;;  %v1978_v49 = vpack.c.bf16 (!%p557_p3), %v1203_v47, %v1202_v46  ;;  %v1982_v51 = vpack.c.bf16 (!%p557_p3), %v1205_v50, %v1204_v48  ;;  %v1787_v54 = vld [vmem:[%s2402_s8] ss:$0 sm:$0xff] (!%p557_p3) }
   0xc   : > { %1967 = vmatprep.subr.bf16.mxu1 (!%p557_p3), %v1966_v14 }
   0xe   : > { %s2418_s21 = smov (!%p660_p4, %s2052_s21), 1 }
   0xf   : > { %s2177_s0 = sshll.u32 %s2418_s21, 6  ;;  %1969 = vmatpush3.bf16.msra.mxu1 %v1966_v14  ;;  %s2233_s27 = sshll.u32 %s2418_s21, 4 }
  0x10   : > { %s667_s20 = scalar_lea.vmem %s2412_s19, %s2177_s0  ;;  %1979 = vmatprep.subr.bf16.mxu1 %v1978_v49  ;;  %s677_s30 = scalar_lea.vmem %s2395_s1, %s2233_s27 }
  0x11   : > { %v729_v4 = vld [vmem:[%s667_s20] sm:$0xff]  ;;  %v730_v5 = vld [vmem:[%s667_s20 + $0x8] sm:$0xff]  ;;  %v731_v6 = vld [vmem:[%s667_s20 + $0x10] sm:$0xff]  ;;  %s2243_s19 = scalar_lea.vmem %s2396_s2, %s2177_s0  ;;  %s707_s25 = scalar_lea.vmem %s2398_s4, %s2233_s27 }
  0x12   : > { %1879 = vmatprep.mubr.msk.f32.mxu0 %vm745_vm1, %v729_v4  ;;  %v732_v7 = vld [vmem:[%s667_s20 + $0x18] sm:$0xff]  ;;  %v733_v8 = vld [vmem:[%s667_s20 + $0x20] sm:$0xff]  ;;  %v734_v9 = vld [vmem:[%s667_s20 + $0x28] sm:$0xff] }
  0x13   : > { %1880 = vmatmul.mubr.msk.f32.vlgmr.msra.gmra.mrb[0].mxu0 %vm745_vm1, %v730_v5  ;;  %v735_v10 = vld [vmem:[%s667_s20 + $0x30] sm:$0xff]  ;;  %v736_v11 = vld [vmem:[%s667_s20 + $0x38] sm:$0xff]  ;;  %v1028_v52 = vld [vmem:[%s677_s30] sm:$0xff] }
  0x14   : > { %1882 = vmatprep.mubr.msk.f32.mxu0 %vm745_vm1, %v731_v6  ;;  %1973 = vmatpush3.bf16.msra.mxu0 %v1970_v18  ;;  %v1030_v53 = vld [vmem:[%s2243_s19] sm:$0xff]  ;;  %v1029_v55 = vld [vmem:[%s677_s30 + $0x8] sm:$0xff]  ;;  %v1032_v62 = vld [vmem:[%s2243_s19 + $0x10] sm:$0xff]  ;;  %s697_s30 = scalar_lea.vmem %s2397_s3, %s2177_s0 }
  0x15   : > { %1975 = vmatprep.subr.bf16.mxu0 %v1974_v20  ;;  %v1031_v56 = vld [vmem:[%s2243_s19 + $0x8] sm:$0xff]  ;;  %v1038_v58 = vsub.f32 %v1028_v52, %v1030_v53  ;;  %v1033_v0 = vld [vmem:[%s2243_s19 + $0x18] sm:$0xff]  ;;  %v1040_v3 = vsub.f32 %v1028_v52, %v1032_v62  ;;  %v1036_v18 = vld [vmem:[%s2243_s19 + $0x30] sm:$0xff] }
  0x16   : > { %v1039_v60 = vsub.f32 %v1029_v55, %v1031_v56  ;;  %v1041_v6 = vsub.f32 %v1029_v55, %v1033_v0  ;;  %v1450_v56 = vld [vmem:[%s2407_s13] sm:$0xff] }
  0x17   : > { %1883 = vmatmul.mubr.msk.f32.gmra.mrb[2].mxu0 %vm745_vm1, %v732_v7 }
  0x18   : > { %1885 = vmatprep.mubr.msk.f32.mxu0 %vm745_vm1, %v733_v8  ;;  %1977 = vmatpush3.bf16.msra.mxu0 %v1974_v20  ;;  %v1034_v8 = vld [vmem:[%s2243_s19 + $0x20] sm:$0xff]  ;;  %v1037_v20 = vld [vmem:[%s2243_s19 + $0x38] sm:$0xff] }
  0x19   : > { %v1042_v13 = vsub.f32 %v1028_v52, %v1034_v8 }
  0x1b   : > { %1886 = vmatmul.mubr.msk.f32.gmra.mrb[4].mxu0 %vm745_vm1, %v734_v9 }
  0x1c   : > { %1888 = vmatprep.mubr.msk.f32.mxu0 %vm745_vm1, %v735_v10  ;;  %v1035_v10 = vld [vmem:[%s2243_s19 + $0x28] sm:$0xff]  ;;  %s2338_s19 = scalar_lea.vmem %s2410_s16, %s2177_s0 }
  0x1d   : > { %v1043_v16 = vsub.f32 %v1029_v55, %v1035_v10 }
  0x1f   : > { %1889 = vmatmul.mubr.msk.f32.gmra.mrb[6].mxu0 %vm745_vm1, %v736_v11 }
  0xe6   : > { %v1881_v22 = vpop.f32.mrb[0].mxu0 }
  0xe7   : > { %v846_v23 = vadd.f32 %v1881_v22, %v1777_v21  ;;  %v840_v24 = vpop.f32.mrb[1].mxu0 }
  0xe8   : > { %v841_v25 = vadd.f32 %v1777_v21, %v840_v24 }
  0xe9   : > { %v880_v28 = vmax.f32 %v846_v23, 0.0  ;;  %v1044_v23 = vsub.f32 %v1028_v52, %v1036_v18 }
  0xea   : > { %v879_v26 = vmax.f32 %v841_v25, 0.0  ;;  %v1884_v27 = vpop.f32.mrb[2].mxu0 }
  0xeb   : > { %v856_v29 = vadd.f32 %v1884_v27, %v1777_v21  ;;  %v850_v30 = vpop.f32.mrb[3].mxu0 }
  0xec   : > { %v851_v31 = vadd.f32 %v1777_v21, %v850_v30  ;;  %1899 = vmatprep.mubr.msk.f32.mxu1 %vm898_vm2, %v879_v26  ;;  %v1045_v26 = vsub.f32 %v1029_v55, %v1037_v20 }
  0xed   : > { %1900 = vmatmul.mubr.msk.f32.vlgmr.msra.gmra.mrb[0].mxu1 %vm898_vm2, %v880_v28  ;;  %v882_v34 = vmax.f32 %v856_v29, 0.0 }
  0xee   : > { %v881_v32 = vmax.f32 %v851_v31, 0.0  ;;  %v1887_v33 = vpop.f32.mrb[4].mxu0  ;;  %1981 = vmatpush3.bf16.msra.mxu1 %v1978_v49  ;;  %v1796_v31 = vld [vmem:[%s2404_s10] ss:$0 sm:$0xff] }
  0xef   : > { %v866_v35 = vadd.f32 %v1887_v33, %v1777_v21  ;;  %v860_v36 = vpop.f32.mrb[5].mxu0  ;;  %1983 = vmatprep.subr.bf16.mxu1 %v1982_v51 }
  0xf0   : > { %v861_v37 = vadd.f32 %v1777_v21, %v860_v36  ;;  %1902 = vmatprep.mubr.msk.f32.mxu1 %vm898_vm2, %v881_v32 }
  0xf1   : > { %1903 = vmatmul.mubr.msk.f32.gmra.mrb[2].mxu1 %vm898_vm2, %v882_v34  ;;  %v884_v40 = vmax.f32 %v866_v35, 0.0 }
  0xf2   : > { %v883_v38 = vmax.f32 %v861_v37, 0.0  ;;  %v1890_v39 = vpop.f32.mrb[6].mxu0  ;;  %1985 = vmatpush3.bf16.msra.mxu1 %v1982_v51 }
  0xf3   : > { %v876_v41 = vadd.f32 %v1890_v39, %v1777_v21  ;;  %v870_v42 = vpop.f32.mrb[7].mxu0 }
  0xf4   : > { %v871_v43 = vadd.f32 %v1777_v21, %v870_v42  ;;  %1905 = vmatprep.mubr.msk.f32.mxu1 %vm898_vm2, %v883_v38 }
  0xf5   : > { %1906 = vmatmul.mubr.msk.f32.gmra.mrb[4].mxu1 %vm898_vm2, %v884_v40  ;;  %v886_v45 = vmax.f32 %v876_v41, 0.0 }
  0xf6   : > { %v885_v44 = vmax.f32 %v871_v43, 0.0 }
  0xf8   : > { %1908 = vmatprep.mubr.msk.f32.mxu1 %vm898_vm2, %v885_v44 }
  0xf9   : > { %1909 = vmatmul.mubr.msk.f32.gmra.mrb[6].mxu1 %vm898_vm2, %v886_v45 }
 0x1c0   : > { %v1901_v57 = vpop.f32.mrb[0].mxu1 }
 0x1c1   : > { %v2250_v59 = vadd.f32 %v1901_v57, %v1787_v54  ;;  %v989_v61 = vpop.f32.mrb[1].mxu1  ;;  %v1451_v57 = vld [vmem:[%s2407_s13 + $0x8] sm:$0xff] }
 0x1c2   : > { %v2253_v63 = vadd.f32 %v1787_v54, %v989_v61  ;;  %v1453_v61 = vld [vmem:[%s2407_s13 + $0x18] sm:$0xff] }
 0x1c3   : > { %v1047_v4 = vadd.f32 %v1039_v60, %v2250_v59  ;;  %v1986_v60 = vpack.c.bf16 %v1451_v57, %v1450_v56 }
 0x1c4   : > { %v1046_v1 = vadd.f32 %v1038_v58, %v2253_v63  ;;  %v1904_v2 = vpop.f32.mrb[2].mxu1  ;;  %v1452_v58 = vld [vmem:[%s2407_s13 + $0x10] sm:$0xff] }
 0x1c5   : > { %v2258_v5 = vadd.f32 %v1904_v2, %v1787_v54  ;;  %v999_v7 = vpop.f32.mrb[3].mxu1  ;;  %v1990_v62 = vpack.c.bf16 %v1453_v61, %v1452_v58  ;;  %1987 = vmatprep.subr.bf16.mxu0 %v1986_v60  ;;  %v1805_v2 = vld [vmem:[%s2406_s12] ss:$0 sm:$0xff] }
 0x1c6   : > { %v2261_v9 = vadd.f32 %v1787_v54, %v999_v7  ;;  %1919 = vmatprep.mubr.msk.f32.mxu0 %vm898_vm2, %v1046_v1 }
 0x1c7   : > { %1920 = vmatmul.mubr.msk.f32.vlgmr.msra.gmra.mrb[8].mxu0 %vm898_vm2, %v1047_v4  ;;  %v1049_v14 = vadd.f32 %v1041_v6, %v2258_v5 }
 0x1c8   : > { %v1048_v11 = vadd.f32 %v1040_v3, %v2261_v9  ;;  %v1907_v12 = vpop.f32.mrb[4].mxu1  ;;  %1989 = vmatpush3.bf16.msra.mxu0 %v1986_v60 }
 0x1c9   : > { %v2268_v15 = vadd.f32 %v1907_v12, %v1787_v54  ;;  %v1009_v17 = vpop.f32.mrb[5].mxu1  ;;  %1991 = vmatprep.subr.bf16.mxu0 %v1990_v62 }
 0x1ca   : > { %v2271_v19 = vadd.f32 %v1787_v54, %v1009_v17  ;;  %1922 = vmatprep.mubr.msk.f32.mxu0 %vm898_vm2, %v1048_v11 }
 0x1cb   : > { %1923 = vmatmul.mubr.msk.f32.gmra.mrb[10].mxu0 %vm898_vm2, %v1049_v14  ;;  %v1051_v24 = vadd.f32 %v1043_v16, %v2268_v15 }
 0x1cc   : > { %v1050_v21 = vadd.f32 %v1042_v13, %v2271_v19  ;;  %v1910_v22 = vpop.f32.mrb[6].mxu1  ;;  %1993 = vmatpush3.bf16.msra.mxu0 %v1990_v62 }
 0x1cd   : > { %v2278_v25 = vadd.f32 %v1910_v22, %v1787_v54  ;;  %v1019_v27 = vpop.f32.mrb[7].mxu1 }
 0x1ce   : > { %v2280_v28 = vadd.f32 %v1787_v54, %v1019_v27  ;;  %1925 = vmatprep.mubr.msk.f32.mxu0 %vm898_vm2, %v1050_v21 }
 0x1cf   : > { %1926 = vmatmul.mubr.msk.f32.gmra.mrb[12].mxu0 %vm898_vm2, %v1051_v24  ;;  %v1053_v30 = vadd.f32 %v1045_v26, %v2278_v25 }
 0x1d0   : > { %v1052_v29 = vadd.f32 %v1044_v23, %v2280_v28 }
 0x1d2   : > { %1928 = vmatprep.mubr.msk.f32.mxu0 %vm898_vm2, %v1052_v29 }
 0x1d3   : > { %1929 = vmatmul.mubr.msk.f32.gmra.mrb[14].mxu0 %vm898_vm2, %v1053_v30 }
 0x29a   : > { %v1921_v32 = vpop.f32.mrb[8].mxu0 }
 0x29b   : > { %v1161_v33 = vadd.f32 %v1921_v32, %v1796_v31  ;;  %v1155_v34 = vpop.f32.mrb[9].mxu0 }
 0x29c   : > { %v1156_v35 = vadd.f32 %v1796_v31, %v1155_v34 }
 0x29d   : > { %v1195_v38 = vmax.f32 %v1161_v33, 0.0 }
 0x29e   : > { %v1194_v36 = vmax.f32 %v1156_v35, 0.0  ;;  %v1924_v37 = vpop.f32.mrb[10].mxu0 }
 0x29f   : > { %v1171_v39 = vadd.f32 %v1924_v37, %v1796_v31  ;;  %v1165_v40 = vpop.f32.mrb[11].mxu0 }
 0x2a0   : > { %v1166_v41 = vadd.f32 %v1796_v31, %v1165_v40  ;;  %1939 = vmatprep.mubr.msk.f32.mxu1 %vm898_vm2, %v1194_v36 }
 0x2a1   : > { %1940 = vmatmul.mubr.msk.f32.vlgmr.msra.gmra.mrb[8].mxu1 %vm898_vm2, %v1195_v38  ;;  %v1197_v44 = vmax.f32 %v1171_v39, 0.0 }
 0x2a2   : > { %v1196_v42 = vmax.f32 %v1166_v41, 0.0  ;;  %v1927_v43 = vpop.f32.mrb[12].mxu0 }
 0x2a3   : > { %v1181_v45 = vadd.f32 %v1927_v43, %v1796_v31  ;;  %v1175_v46 = vpop.f32.mrb[13].mxu0 }
 0x2a4   : > { %v1176_v47 = vadd.f32 %v1796_v31, %v1175_v46  ;;  %1942 = vmatprep.mubr.msk.f32.mxu1 %vm898_vm2, %v1196_v42 }
 0x2a5   : > { %1943 = vmatmul.mubr.msk.f32.gmra.mrb[10].mxu1 %vm898_vm2, %v1197_v44  ;;  %v1199_v50 = vmax.f32 %v1181_v45, 0.0 }
 0x2a6   : > { %v1198_v48 = vmax.f32 %v1176_v47, 0.0  ;;  %v1930_v49 = vpop.f32.mrb[14].mxu0 }
 0x2a7   : > { %v1191_v51 = vadd.f32 %v1930_v49, %v1796_v31  ;;  %v1185_v52 = vpop.f32.mrb[15].mxu0 }
 0x2a8   : > { %v1186_v53 = vadd.f32 %v1796_v31, %v1185_v52  ;;  %1945 = vmatprep.mubr.msk.f32.mxu1 %vm898_vm2, %v1198_v48 }
 0x2a9   : > { %1946 = vmatmul.mubr.msk.f32.gmra.mrb[12].mxu1 %vm898_vm2, %v1199_v50  ;;  %v1201_v55 = vmax.f32 %v1191_v51, 0.0 }
 0x2aa   : > { %v1200_v54 = vmax.f32 %v1186_v53, 0.0 }
 0x2ac   : > { %1948 = vmatprep.mubr.msk.f32.mxu1 %vm898_vm2, %v1200_v54 }
 0x2ad   : > { %1949 = vmatmul.mubr.msk.f32.gmra.mrb[14].mxu1 %vm898_vm2, %v1201_v55 }
 0x374   : > { %v1941_v0 = vpop.f32.mrb[8].mxu1 }
 0x375   : > { %v1303_v1 = vpop.f32.mrb[9].mxu1  ;;  %v1309_v6 = vadd.f32 %v1941_v0, %v1805_v2 }
 0x376   : > { %v1304_v7 = vadd.f32 %v1805_v2, %v1303_v1 }
 0x377   : > { %v1349_v13 = vsel %vm898_vm2, %v1309_v6, -inf }
 0x378   : > { %v1944_v3 = vpop.f32.mrb[10].mxu1  ;;  %v1342_v17 = vsel %vm898_vm2, %v1304_v7, -inf }
 0x379   : > { %v1313_v4 = vpop.f32.mrb[11].mxu1  ;;  %v1319_v14 = vadd.f32 %v1944_v3, %v1805_v2 }
 0x37a   : > { %v1314_v18 = vadd.f32 %v1805_v2, %v1313_v4 }
 0x37b   : > { %v1350_v29 = vsel %vm898_vm2, %v1319_v14, -inf }
 0x37c   : > { %v1947_v8 = vpop.f32.mrb[12].mxu1  ;;  %v1343_v31 = vsel %vm898_vm2, %v1314_v18, -inf }
 0x37d   : > { %v1329_v10 = vadd.f32 %v1947_v8, %v1805_v2  ;;  %v1323_v11 = vpop.f32.mrb[13].mxu1 }
 0x37e   : > { %v1324_v12 = vadd.f32 %v1805_v2, %v1323_v11 }
 0x37f   : > { %v1351_v16 = vsel %vm898_vm2, %v1329_v10, -inf }
 0x380   : > { %v1352_v20 = vmax.f32 %v1349_v13, %v1351_v16  ;;  %v1344_v21 = vsel %vm898_vm2, %v1324_v12, -inf  ;;  %v1950_v22 = vpop.f32.mrb[14].mxu1  ;;  %v1413_v16 = vld [vmem:[%s697_s30 + $0x8] sm:$0xff] }
 0x381   : > { %v1345_v23 = vmax.f32 %v1342_v17, %v1344_v21  ;;  %v1339_v24 = vadd.f32 %v1950_v22, %v1805_v2  ;;  %v1333_v26 = vpop.f32.mrb[15].mxu1  ;;  %v1415_v17 = vld [vmem:[%s697_s30 + $0x18] sm:$0xff]  ;;  %v1421_v22 = vadd.f32 %v1413_v16, %v2250_v59 }
 0x382   : > { %v1334_v27 = vadd.f32 %v1805_v2, %v1333_v26 }
 0x383   : > { %v1353_v30 = vsel %vm898_vm2, %v1339_v24, -inf }
 0x384   : > { %v1354_v32 = vmax.f32 %v1350_v29, %v1353_v30  ;;  %v1346_v33 = vsel %vm898_vm2, %v1334_v27, -inf  ;;  %v1414_v29 = vld [vmem:[%s697_s30 + $0x10] sm:$0xff]  ;;  %v1416_v30 = vld [vmem:[%s697_s30 + $0x20] sm:$0xff] }
 0x385   : > { %v1347_v34 = vmax.f32 %v1343_v31, %v1346_v33  ;;  %v1418_v31 = vld [vmem:[%s697_s30 + $0x30] sm:$0xff] }
 0x386   : > { %v1355_v35 = vmax.f32 %v1352_v20, %v1354_v32  ;;  %v1419_v20 = vld [vmem:[%s697_s30 + $0x38] sm:$0xff] }
 0x387   : > { %v1348_v36 = vmax.f32 %v1345_v23, %v1347_v34  ;;  %v1412_v23 = vld [vmem:[%s697_s30] sm:$0xff] }
 0x388   : > { %v1357_v37 = vsub.f32 %v1309_v6, %v1355_v35  ;;  %v1359_v38 = vsub.f32 %v1319_v14, %v1355_v35  ;;  %v1361_v39 = vsub.f32 %v1329_v10, %v1355_v35  ;;  %v1363_v40 = vsub.f32 %v1339_v24, %v1355_v35 }
 0x389   : > { %v1356_v41 = vsub.f32 %v1304_v7, %v1348_v36  ;;  %v1358_v42 = vsub.f32 %v1314_v18, %v1348_v36  ;;  %v1360_v43 = vsub.f32 %v1324_v12, %v1348_v36  ;;  %v1362_v44 = vsub.f32 %v1334_v27, %v1348_v36  ;;  %v1417_v18 = vld [vmem:[%s697_s30 + $0x28] sm:$0xff]  ;;  %s717_s30 = scalar_lea.vmem %s2409_s15, %s2233_s27 }
 0x38a   : > { %v1366_v45 = vmul.f32 1.442695, %v1357_v37  ;;  %v1370_v46 = vmul.f32 1.442695, %v1359_v38  ;;  %v1374_v47 = vmul.f32 1.442695, %v1361_v39  ;;  %v1423_v24 = vadd.f32 %v1415_v17, %v2258_v5 }
 0x38b   : > { %v1378_v48 = vmul.f32 1.442695, %v1363_v40  ;;  %v1364_v49 = vmul.f32 1.442695, %v1356_v41  ;;  %v1368_v50 = vmul.f32 1.442695, %v1358_v42  ;;  %v1425_v26 = vadd.f32 %v1417_v18, %v2268_v15 }
 0x38c   : > { %2018 = vpow2.f32 %v1366_v45  ;;  %v1372_v51 = vmul.f32 1.442695, %v1360_v43  ;;  %v1376_v52 = vmul.f32 1.442695, %v1362_v44  ;;  %v1427_v27 = vadd.f32 %v1419_v20, %v2278_v25 }
 0x38d   : > { %2020 = vpow2.f32 %v1370_v46  ;;  %v1420_v37 = vadd.f32 %v1412_v23, %v2253_v63  ;;  %v1422_v38 = vadd.f32 %v1414_v29, %v2261_v9  ;;  %v1424_v39 = vadd.f32 %v1416_v30, %v2271_v19 }
 0x38e   : > { %2022 = vpow2.f32 %v1374_v47  ;;  %v1426_v40 = vadd.f32 %v1418_v31, %v2280_v28 }
 0x38f   : > { %2024 = vpow2.f32 %v1378_v48 }
 0x390   : > { %2026 = vpow2.f32 %v1364_v49 }
 0x391   : > { %2028 = vpow2.f32 %v1368_v50 }
 0x392   : > { %2030 = vpow2.f32 %v1372_v51 }
 0x393   : > { %2032 = vpow2.f32 %v1376_v52 }
 0x396   : > { %v2019_v53 = vpop.eup %2018 }
 0x397   : > { %v2021_v54 = vpop.eup %2020  ;;  %v1387_v55 = vsel %vm898_vm2, %v2019_v53, 0.0 }
 0x398   : > { %v2023_v56 = vpop.eup %2022  ;;  %v1388_v57 = vsel %vm898_vm2, %v2021_v54, 0.0 }
 0x399   : > { %v2025_v58 = vpop.eup %2024  ;;  %v1389_v60 = vadd.f32 %v1388_v57, %v1387_v55  ;;  %v1390_v62 = vsel %vm898_vm2, %v2023_v56, 0.0 }
 0x39a   : > { %v2027_v61 = vpop.eup %2026  ;;  %v1392_v4 = vsel %vm898_vm2, %v2025_v58, 0.0 }
 0x39b   : > { %v2029_v0 = vpop.eup %2028  ;;  %v1391_v1 = vadd.f32 %v1390_v62, %v1389_v60  ;;  %v1380_v2 = vsel %vm898_vm2, %v2027_v61, 0.0  ;;  %v1814_v60 = vld [vmem:[%s2408_s14] ss:$0 sm:$0xff]  ;;  %v1543_v62 = vld [vmem:[%s707_s25 + $0x8] sm:$0xff] }
 0x39c   : > { %v2031_v3 = vpop.eup %2030  ;;  %v1381_v6 = vsel %vm898_vm2, %v2029_v0, 0.0 }
 0x39d   : > { %v2033_v7 = vpop.eup %2032  ;;  %v1393_v8 = vadd.f32 %v1392_v4, %v1391_v1  ;;  %v1382_v10 = vadd.f32 %v1381_v6, %v1380_v2  ;;  %v1383_v11 = vsel %vm898_vm2, %v2031_v3, 0.0  ;;  %v1542_v2 = vld [vmem:[%s707_s25] sm:$0xff] }
 0x39e   : > { %v1385_v13 = vsel %vm898_vm2, %v2033_v7, 0.0 }
 0x39f   : > { %2034 = vrcp.f32 %v1393_v8  ;;  %v1384_v12 = vadd.f32 %v1383_v11, %v1382_v10 }
 0x3a1   : > { %v1386_v14 = vadd.f32 %v1385_v13, %v1384_v12 }
 0x3a3   : > { %2036 = vrcp.f32 %v1386_v14 }
 0x3a9   : > { %v2035_v21 = vpop.eup %2034 }
 0x3aa   : > { %v1397_v32 = vmul.f32 %v2035_v21, %v2019_v53  ;;  %v1399_v33 = vmul.f32 %v2035_v21, %v2021_v54  ;;  %v1403_v34 = vmul.f32 %v2035_v21, %v2025_v58  ;;  %v1401_v35 = vmul.f32 %v2035_v21, %v2023_v56 }
 0x3ac   : > { %1405 = vst.msk [vmem:[%s2338_s19 + $0x8] sm:$0xff] %vm898_vm2, %v1397_v32  ;;  %1407 = vst.msk [vmem:[%s2338_s19 + $0x18] sm:$0xff] %vm898_vm2, %v1399_v33  ;;  %v1435_v59 = vmul.f32 %v1427_v27, %v1403_v34  ;;  %v1429_v5 = vmul.f32 %v1421_v22, %v1397_v32  ;;  %v1431_v15 = vmul.f32 %v1423_v24, %v1399_v33 }
 0x3ad   : > { %1411 = vst.msk [vmem:[%s2338_s19 + $0x38] sm:$0xff] %vm898_vm2, %v1403_v34  ;;  %1409 = vst.msk [vmem:[%s2338_s19 + $0x28] sm:$0xff] %vm898_vm2, %v1401_v35  ;;  %v1433_v25 = vmul.f32 %v1425_v26, %v1401_v35  ;;  %v2037_v36 = vpop.eup %2036 }
 0x3ae   : > { %v1396_v41 = vmul.f32 %v2037_v36, %v2027_v61  ;;  %v1398_v42 = vmul.f32 %v2037_v36, %v2029_v0  ;;  %v1400_v43 = vmul.f32 %v2037_v36, %v2031_v3  ;;  %v1402_v44 = vmul.f32 %v2037_v36, %v2033_v7 }
 0x3af   : > { %v1443_v45 = vsel %vm898_vm2, %v1429_v5, 0.0  ;;  %v1444_v46 = vsel %vm898_vm2, %v1431_v15, 0.0  ;;  %v1446_v50 = vsel %vm898_vm2, %v1433_v25, 0.0  ;;  %v1448_v54 = vsel %vm898_vm2, %v1435_v59, 0.0 }
 0x3b0   : > { %1404 = vst.msk [vmem:[%s2338_s19] sm:$0xff] %vm898_vm2, %v1396_v41  ;;  %1406 = vst.msk [vmem:[%s2338_s19 + $0x10] sm:$0xff] %vm898_vm2, %v1398_v42  ;;  %v1428_v63 = vmul.f32 %v1420_v37, %v1396_v41  ;;  %v1430_v9 = vmul.f32 %v1422_v38, %v1398_v42  ;;  %v1432_v19 = vmul.f32 %v1424_v39, %v1400_v43 }
 0x3b1   : > { %1408 = vst.msk [vmem:[%s2338_s19 + $0x20] sm:$0xff] %vm898_vm2, %v1400_v43  ;;  %1410 = vst.msk [vmem:[%s2338_s19 + $0x30] sm:$0xff] %vm898_vm2, %v1402_v44  ;;  %v1434_v28 = vmul.f32 %v1426_v40, %v1402_v44  ;;  %v1445_v47 = vadd.f32 %v1444_v46, %v1443_v45 }
 0x3b2   : > { %v1436_v48 = vsel %vm898_vm2, %v1428_v63, 0.0  ;;  %v1437_v49 = vsel %vm898_vm2, %v1430_v9, 0.0  ;;  %v1439_v53 = vsel %vm898_vm2, %v1432_v19, 0.0 }
 0x3b3   : > { %v1438_v51 = vadd.f32 %v1437_v49, %v1436_v48  ;;  %v1447_v52 = vadd.f32 %v1446_v50, %v1445_v47  ;;  %v1441_v57 = vsel %vm898_vm2, %v1434_v28, 0.0 }
 0x3b5   : > { %v1440_v55 = vadd.f32 %v1439_v53, %v1438_v51  ;;  %v1449_v56 = vadd.f32 %v1448_v54, %v1447_v52 }
 0x3b7   : > { %v1442_v58 = vadd.f32 %v1441_v57, %v1440_v55 }
 0x3b9   : > { %1959 = vmatprep.mubr.msk.f32.mxu0 %vm898_vm2, %v1442_v58 }
 0x3ba   : > { %1960 = vmatmul.mubr.msk.f32.vlgmr.msra.gmra.mrb[16].mxu0 %vm898_vm2, %v1449_v56 }
 0x48d   : > { %v1961_v61 = vpop.f32.mrb[16].mxu0 }
 0x48e   : > { %v1539_v0 = vadd.f32 %v1961_v61, %v1814_v60  ;;  %v1533_v1 = vpop.f32.mrb[17].mxu0 }
 0x48f   : > { %v1534_v3 = vadd.f32 %v1814_v60, %v1533_v1 }
 0x490   : > { %v1545_v4 = vadd.f32 %v1543_v62, %v1539_v0 }
 0x491   : > { %v1544_v6 = vadd.f32 %v1542_v2, %v1534_v3 }
 0x492   : > { %1548 = vst.msk [vmem:[%s717_s30 + $0x8] sm:$0xff] %vm1546_vm3, %v1545_v4 }
 0x493   : > { %1547 = vst.msk [vmem:[%s717_s30] sm:$0xff] %vm1546_vm3, %v1544_v6 }
 0x494 PF: > { %s27_s23 = sadd.s32 1, %s2060_s23   ;;  %s2413_s21 = smov %s2056_s22 }
 0x495   : > { %p24_p5 = scmp.ge.s32.totalorder %s27_s23, 4   ;;  %s2414_s22 = smov %s2416_s24 }
 0x497   :  { %26 = sbr.rel (!%p24_p5) target bundleno = 2 (0x2), region = 134 }

</bundles_post_ra>
